<compile_context>
chip_gen: v7x
topology: tpu7x:2x2x1
jax: 0.10.0
libtpu: 0.0.40
codegen_flags: <defaults>
</compile_context>

<pallas_src>
import functools

import jax
import jax.numpy as jnp
from jax import lax
from jax.experimental import pallas as pl
from jax.experimental.pallas import tpu as pltpu


def _round_up(n, m):
    return ((n + m - 1) // m) * m


def _mlp_kernel(x_ref, w1_ref, b1_ref, w2_ref, b2_ref, w3_ref, b3_ref, o_ref,
                *, x_transposed):
    xb = x_ref[...]                       # no upcast: MXU consumes bf16/f32 directly
    w1 = w1_ref[...].astype(xb.dtype)     # tiny (10, in) cast keeps operand dtypes matched

    if x_transposed:
        # x block is (in, TILE_B): canonical W1 @ X matmul, batch on the lane axis.
        h1 = jnp.dot(w1, xb, preferred_element_type=jnp.float32)
    else:
        # x block is (TILE_B, in): W1 @ x^T via a trans-B contraction (native MXU
        # "NT" matmul; no materialized transpose / relayout of the big x tile).
        h1 = lax.dot_general(
            w1, xb,
            dimension_numbers=(((1,), (1,)), ((), ())),
            preferred_element_type=jnp.float32,
        )
    h1 = jnp.tanh(h1 + b1_ref[...])                                   # (10, TILE_B) f32

    h2 = jnp.tanh(
        jnp.dot(w2_ref[...], h1, preferred_element_type=jnp.float32) + b2_ref[...]
    )                                                                 # (5, TILE_B)

    out = jnp.dot(w3_ref[...], h2, preferred_element_type=jnp.float32) + b3_ref[...]
    o_ref[...] = out.astype(o_ref.dtype)                              # lane-dense (1, TILE_B)


def electricity_price_predictor(x, params, *, tile_b=None, x_transposed=False):
    """Fused forward pass of ElectricityPricePredictor.

    x: [B, input_size] (f32 or bf16), or [input_size, B] if x_transposed=True
       (recommended lane-dense fast path when the producer can emit it).
    params: (w1, b1, w2, b2, w3, b3) with PyTorch [out, in] weights, [out, 1] biases.
    Returns [B, 1] float32.
    """
    w1, b1, w2, b2, w3, b3 = params
    if x_transposed:
        in_size, B = x.shape
    else:
        B, in_size = x.shape

    # --- batch tile selection (no padding: Pallas edge blocks handle the tail) ---
    if tile_b is None:
        if B <= 1024:
            tile = B                                    # single block, whole batch
        else:
            # >= ~8 grid steps for megacore sharding, capped so each step still
            # moves a multi-MiB x payload (amortizes ~0.35us fixed per-step cost).
            tile = min(32768, max(128, _round_up(pl.cdiv(B, 8), 128)))
    elif B <= tile_b:
        tile = B
    else:
        assert tile_b % 128 == 0, "tile_b must be a multiple of 128"
        tile = tile_b
    n_tiles = pl.cdiv(B, tile)

    # --- explicit VMEM budget (double-buffered x stream + resident output row) ---
    itemsize = jnp.dtype(x.dtype).itemsize
    if x_transposed:
        x_buf = _round_up(in_size, 8) * _round_up(tile, 128) * itemsize
    else:
        x_buf = _round_up(tile, 8) * 128 * itemsize     # in_size lane-padded to 128
    out_buf = 8 * _round_up(tile, 128) * 4
    vmem_limit = int(min(max(2 * (x_buf + out_buf) + (4 << 20), 32 << 20), 60 << 20))

    whole = lambda a: pl.BlockSpec(a.shape, lambda i: (0,) * a.ndim)
    if x_transposed:
        x_spec = pl.BlockSpec((in_size, tile), lambda i: (0, i))
    else:
        x_spec = pl.BlockSpec((tile, in_size), lambda i: (i, 0))

    flops = 2 * B * (in_size * 10 + 10 * 5 + 5 * 1)
    bytes_accessed = (
        B * in_size * itemsize                      # x reads (dominant term)
        + B * 4                                     # output writes
        + sum(int(p.size) * 4 for p in params)      # resident weights/biases
    )

    out_t = pl.pallas_call(
        functools.partial(_mlp_kernel, x_transposed=x_transposed),
        out_shape=jax.ShapeDtypeStruct((1, B), jnp.float32),
        grid=(n_tiles,),
        in_specs=[
            x_spec,                                  # x streamed over the batch
            whole(w1), whole(b1),                    # tiny weights stay resident
            whole(w2), whole(b2),
            whole(w3), whole(b3),
        ],
        out_specs=pl.BlockSpec((1, tile), lambda i: (0, i)),   # lane-dense output row
        compiler_params=pltpu.CompilerParams(
            dimension_semantics=("parallel",),
            vmem_limit_bytes=vmem_limit,
        ),
        cost_estimate=pl.CostEstimate(
            flops=flops,
            transcendentals=B * 15,                  # tanh on (10 + 5) features per row
            bytes_accessed=int(bytes_accessed),
        ),
    )(x, w1, b1, w2, b2, w3, b3)

    # Back to the PyTorch output layout [B, 1].
    return out_t.reshape(B, 1)


def init_params(key, input_size):
    """nn.Linear-style U(-1/sqrt(fan_in), 1/sqrt(fan_in)) init.

    Weights are stored in PyTorch layout [out_features, in_features];
    biases as column vectors [out_features, 1]."""
    dims = [(10, input_size), (5, 10), (1, 5)]   # (out_features, in_features)
    params = []
    for fan_out, fan_in in dims:
        key, kw, kb = jax.random.split(key, 3)
        bound = 1.0 / jnp.sqrt(jnp.float32(fan_in))
        w = jax.random.uniform(kw, (fan_out, fan_in), jnp.float32, -bound, bound)
        b = jax.random.uniform(kb, (fan_out, 1), jnp.float32, -bound, bound)
        params += [w, b]
    return tuple(params)


def reference_forward(x, params):
    w1, b1, w2, b2, w3, b3 = params
    h1 = jnp.tanh(x @ w1.T + b1[:, 0])
    h2 = jnp.tanh(h1 @ w2.T + b2[:, 0])
    return h2 @ w3.T + b3[:, 0]


if __name__ == "__main__":
    key = jax.random.PRNGKey(0)
    k_x, k_p = jax.random.split(key)

    # Small demo shapes; batch=200 is NOT a multiple of the tile, exercising the
    # edge-block (tail) path without any wrapper padding.
    batch, input_size = 200, 16
    x = jax.random.normal(k_x, (batch, input_size), jnp.float32)
    params = init_params(k_p, input_size)
    y_ref = reference_forward(x, params)

    # 1) Multi-step batch grid with a masked tail block (tile=128, 2 grid steps).
    y = jax.block_until_ready(electricity_price_predictor(x, params, tile_b=128))
    assert y.shape == (batch, 1)
    assert jnp.allclose(y, y_ref, atol=1e-5, rtol=1e-5), "mismatch vs JAX reference (f32, tiled)"

    # 2) Default auto tile selection (single whole-batch block at this size).
    y = jax.block_until_ready(electricity_price_predictor(x, params))
    assert jnp.allclose(y, y_ref, atol=1e-5, rtol=1e-5), "mismatch vs JAX reference (f32, auto)"

    # 3) Recommended fast path: bf16 x presented transposed [in, B] (lane-dense batch).
    y_fast = jax.block_until_ready(
        electricity_price_predictor(
            x.T.astype(jnp.bfloat16), params, tile_b=128, x_transposed=True
        )
    )
    assert y_fast.shape == (batch, 1)
    assert jnp.allclose(y_fast, y_ref, atol=5e-2), "mismatch vs JAX reference (bf16 path)"

    print("KERNEL_OK")
</pallas_src>

<mosaic_0001>
module attributes {stable_mosaic.version = 11 : i64} {
  func.func @_mlp_kernel(%arg0: i32, %arg1: memref<128x16xf32, #tpu.memory_space<vmem>>, %arg2: memref<10x16xf32, #tpu.memory_space<vmem>>, %arg3: memref<10x1xf32, #tpu.memory_space<vmem>>, %arg4: memref<5x10xf32, #tpu.memory_space<vmem>>, %arg5: memref<5x1xf32, #tpu.memory_space<vmem>>, %arg6: memref<1x5xf32, #tpu.memory_space<vmem>>, %arg7: memref<1x1xf32, #tpu.memory_space<vmem>>, %arg8: memref<1x128xf32, #tpu.memory_space<vmem>>) attributes {dimension_semantics = [#tpu.dimension_semantics<parallel>], iteration_bounds = array<i64: 2>, scalar_prefetch = 0 : i64, scratch_operands = 0 : i64, tpu.core_type = #tpu.core_type<tc>, window_params = [{transform_indices = @transform_0, window_bounds = array<i64: 128, 16>}, {pipeline_mode = #tpu.pipeline_mode<synchronous>, transform_indices = @transform_1, window_bounds = array<i64: 10, 16>}, {pipeline_mode = #tpu.pipeline_mode<synchronous>, transform_indices = @transform_2, window_bounds = array<i64: 10, 1>}, {pipeline_mode = #tpu.pipeline_mode<synchronous>, transform_indices = @transform_3, window_bounds = array<i64: 5, 10>}, {pipeline_mode = #tpu.pipeline_mode<synchronous>, transform_indices = @transform_4, window_bounds = array<i64: 5, 1>}, {pipeline_mode = #tpu.pipeline_mode<synchronous>, transform_indices = @transform_5, window_bounds = array<i64: 1, 5>}, {pipeline_mode = #tpu.pipeline_mode<synchronous>, transform_indices = @transform_6, window_bounds = array<i64: 1, 1>}, {transform_indices = @transform_7, window_bounds = array<i64: 1, 128>}]} {
    %c0 = arith.constant 0 : index
    %c0_0 = arith.constant 0 : index
    %0 = vector.load %arg1[%c0, %c0_0] : memref<128x16xf32, #tpu.memory_space<vmem>>, vector<128x16xf32>
    %c0_1 = arith.constant 0 : index
    %c0_2 = arith.constant 0 : index
    %1 = vector.load %arg2[%c0_1, %c0_2] : memref<10x16xf32, #tpu.memory_space<vmem>>, vector<10x16xf32>
    %cst = arith.constant dense<0.000000e+00> : vector<10x128xf32>
    %2 = tpu.matmul %1, %0, %cst {dimension_numbers = #tpu.dot_dimension_numbers<[1], [1], [0], [0], [0, 0, 1, 0], [], []>} : vector<10x16xf32>, vector<128x16xf32>, vector<10x128xf32> -> vector<10x128xf32>
    %c0_3 = arith.constant 0 : index
    %c0_4 = arith.constant 0 : index
    %3 = vector.load %arg3[%c0_3, %c0_4] : memref<10x1xf32, #tpu.memory_space<vmem>>, vector<10x1xf32>
    %4 = vector.broadcast %3 : vector<10x1xf32> to vector<10x128xf32>
    %5 = arith.addf %2, %4 : vector<10x128xf32>
    %6 = math.tanh %5 : vector<10x128xf32>
    %c0_5 = arith.constant 0 : index
    %c0_6 = arith.constant 0 : index
    %7 = vector.load %arg4[%c0_5, %c0_6] : memref<5x10xf32, #tpu.memory_space<vmem>>, vector<5x10xf32>
    %cst_7 = arith.constant dense<0.000000e+00> : vector<5x128xf32>
    %8 = tpu.matmul %7, %6, %cst_7 {dimension_numbers = #tpu.dot_dimension_numbers<[1], [0], [0], [1], [0, 0, 1, 1], [], []>} : vector<5x10xf32>, vector<10x128xf32>, vector<5x128xf32> -> vector<5x128xf32>
    %c0_8 = arith.constant 0 : index
    %c0_9 = arith.constant 0 : index
    %9 = vector.load %arg5[%c0_8, %c0_9] : memref<5x1xf32, #tpu.memory_space<vmem>>, vector<5x1xf32>
    %10 = vector.broadcast %9 : vector<5x1xf32> to vector<5x128xf32>
    %11 = arith.addf %8, %10 : vector<5x128xf32>
    %12 = math.tanh %11 : vector<5x128xf32>
    %c0_10 = arith.constant 0 : index
    %c0_11 = arith.constant 0 : index
    %13 = vector.load %arg6[%c0_10, %c0_11] : memref<1x5xf32, #tpu.memory_space<vmem>>, vector<1x5xf32>
    %cst_12 = arith.constant dense<0.000000e+00> : vector<1x128xf32>
    %14 = tpu.matmul %13, %12, %cst_12 {dimension_numbers = #tpu.dot_dimension_numbers<[1], [0], [0], [1], [0, 0, 1, 1], [], []>} : vector<1x5xf32>, vector<5x128xf32>, vector<1x128xf32> -> vector<1x128xf32>
    %c0_13 = arith.constant 0 : index
    %c0_14 = arith.constant 0 : index
    %15 = vector.load %arg7[%c0_13, %c0_14] : memref<1x1xf32, #tpu.memory_space<vmem>>, vector<1x1xf32>
    %16 = vector.broadcast %15 : vector<1x1xf32> to vector<1x128xf32>
    %17 = arith.addf %14, %16 : vector<1x128xf32>
    %c0_15 = arith.constant 0 : index
    %c0_16 = arith.constant 0 : index
    %18 = vector.load %arg8[%c0_15, %c0_16] : memref<1x128xf32, #tpu.memory_space<vmem>>, vector<1x128xf32>
    tpu.vector_store %arg8[%c0_15, %c0_16], %17 {strides = array<i32>} : memref<1x128xf32, #tpu.memory_space<vmem>>, vector<1x128xf32>,
    return
  }
  func.func @transform_0(%arg0: i32) -> (i32, i32) {
    %c0_i32 = arith.constant 0 : i32
    %c0_i32_0 = arith.constant 0 : i32
    return %arg0, %c0_i32 : i32, i32
  }
  func.func @transform_1(%arg0: i32) -> (i32, i32) {
    %c0_i32 = arith.constant 0 : i32
    %c0_i32_0 = arith.constant 0 : i32
    %c0_i32_1 = arith.constant 0 : i32
    return %c0_i32, %c0_i32_0 : i32, i32
  }
  func.func @transform_2(%arg0: i32) -> (i32, i32) {
    %c0_i32 = arith.constant 0 : i32
    %c0_i32_0 = arith.constant 0 : i32
    %c0_i32_1 = arith.constant 0 : i32
    return %c0_i32, %c0_i32_0 : i32, i32
  }
  func.func @transform_3(%arg0: i32) -> (i32, i32) {
    %c0_i32 = arith.constant 0 : i32
    %c0_i32_0 = arith.constant 0 : i32
    %c0_i32_1 = arith.constant 0 : i32
    return %c0_i32, %c0_i32_0 : i32, i32
  }
  func.func @transform_4(%arg0: i32) -> (i32, i32) {
    %c0_i32 = arith.constant 0 : i32
    %c0_i32_0 = arith.constant 0 : i32
    %c0_i32_1 = arith.constant 0 : i32
    return %c0_i32, %c0_i32_0 : i32, i32
  }
  func.func @transform_5(%arg0: i32) -> (i32, i32) {
    %c0_i32 = arith.constant 0 : i32
    %c0_i32_0 = arith.constant 0 : i32
    %c0_i32_1 = arith.constant 0 : i32
    return %c0_i32, %c0_i32_0 : i32, i32
  }
  func.func @transform_6(%arg0: i32) -> (i32, i32) {
    %c0_i32 = arith.constant 0 : i32
    %c0_i32_0 = arith.constant 0 : i32
    %c0_i32_1 = arith.constant 0 : i32
    return %c0_i32, %c0_i32_0 : i32, i32
  }
  func.func @transform_7(%arg0: i32) -> (i32, i32) {
    %c0_i32 = arith.constant 0 : i32
    %c0_i32_0 = arith.constant 0 : i32
    return %c0_i32, %arg0 : i32, i32
  }
}

</mosaic_0001>

<bundles_post_ra>
// kernel: tpu_custom_call.1
= control target key start
LH: loop header
LB: loop body
LE: loop exit
PB: predicated region body
PF: predicated region fallthrough
CT: control target
= control target key end

     0   :  { %s1204_s0 = inlined_call_operand.vmem [shape: f32[200,16], index: 0, kind: input, shape index: {}]   ;;  %s1205_s1 = inlined_call_operand.vmem [shape: f32[10,16], index: 1, kind: input, shape index: {}]   ;;  %s1206_s2 = inlined_call_operand.vmem [shape: f32[10,1], index: 2, kind: input, shape index: {}]   ;;  %s1207_s3 = inlined_call_operand.vmem [shape: f32[5,10], index: 3, kind: input, shape index: {}]   ;;  %s1208_s4 = inlined_call_operand.vmem [shape: f32[5,1], index: 4, kind: input, shape index: {}]   ;;  %s1209_s5 = inlined_call_operand.vmem [shape: f32[1,5], index: 5, kind: input, shape index: {}]   ;;  %s1210_s6 = inlined_call_operand.<no memory space> [shape: f32[1,1], index: 6, kind: input, shape index: {}]   ;;  %s1211_s7 = inlined_call_operand.hbm [shape: f32[1,200], index: 7, kind: output, shape index: {}]  }
   0x1   :  { %v12_v0 = vstv %s1210_s6 }
   0x2   :  { %13 = vst [vmem:[#allocation2] sm:$0x1] %v12_v0 }
   0x3   :  { %14 = vsyncpa [#allocation4], 0 }
   0x4   :  { %16 = vsyncpa [#allocation4 + $0x1], 0  ;;  %s1024_s26 = smov 0   ;;  %s1026_s27 = smov 0  }
   0x5   :  { %s1028_s28 = smov 0   ;;  %s1030_s29 = smov 0  }
   0x6 LB: > { %s705_s6 = sadd.s32 4294967295, %s973_s29   ;;  %s706_s30 = sadd.s32 4294967294, %s973_s29   ;;  %s973_s29 = sphi %s1030_s29, %s1219_s29   ;;  %s969_s28 = sphi %s1028_s28, %s1218_s28   ;;  %s965_s27 = sphi %s1026_s27, %s1217_s27   ;;  %s961_s26 = sphi %s1024_s26, %s1216_s26  }
   0x7   : > { %s1047_s8 = sadd.s32 1, %s973_s29   ;;  %s181_s9 = sadd.s32 1, %s969_s28 }
   0x8   : > { %s178_s10 = ssub.s32 %s973_s29, %s1047_s8  ;;  %p191_p0 = scmp.ne.s32.totalorder %s969_s28, %s965_s27 }
   0x9   : > { %p179_p1 = scmp.eq.s32.totalorder %s178_s10, 0  ;;  %p192_p2 = scmp.eq.s32.totalorder %s705_s6, 1 }
   0xa   : > { %p197_p3 = scmp.ne.s32.totalorder %s965_s27, %s961_s26  ;;  %p198_p4 = scmp.eq.s32.totalorder %s706_s30, 1 }
   0xb   : > { %s1057_s11 = scalar_select %p179_p1, %s969_s28, %s181_s9  }
   0xc   : > { %p1059_p5 = por %p192_p2, %p191_p0  ;;  %p1063_p6 = por %p198_p4, %p197_p3 }
   0xd   : > { %p709_p7 = scmp.ge.s32.totalorder %s973_s29, 1  ;;  %p251_p8 = scmp.lt.s32.totalorder %s973_s29, 3 }
   0xf   : > { %p252_p9 = pnand %p709_p7, %p251_p8 }
  0x10   : > { %s1069_s14 = sshll.u32 (!%p252_p9), %s705_s6, 4  ;;  %vm330_vm0 = vcmask (!%p252_p9), 130048   ;;  %v316_v1 = vld [vmem:[%s1205_s1] sm:$0xff] (!%p252_p9)  ;;  %v975_v2 = vmov (!%p252_p9), 0   ;;  %v319_v4 = vld [vmem:[%s1206_s2 + $0x8] sm:$0x3] (!%p252_p9)  ;;  %v555_v51 = vlaneseq (!%p252_p9) }
  0x11   : > { %255 = sbr.rel (%p252_p9) target bundleno = 780 (0x30c), region = 48  ;;  %p291_p10 = scmp.lt.s32.totalorder (!%p252_p9), %s1069_s14, 24  ;;  %792 = vmatprep.mubr.msk.f32.mxu0 (!%p252_p9), %vm330_vm0, %v316_v1  ;;  %903 = vset.pattern.permute.xlu0 (!%p252_p9), %v975_v2  ;;  %v318_v3 = vld [vmem:[%s1206_s2] sm:$0xff] (!%p252_p9)  ;;  %vm1090_vm1 = vmpackc.low (!%p252_p9), %vm330_vm0, %vm330_vm0  ;;  %v317_v30 = vld [vmem:[%s1205_s1 + $0x8] sm:$0x3] (!%p252_p9)  ;;  %v976_v31 = vmov (!%p252_p9), 0.0|0.0  }
  0x12   : > { %322 = vperm.xlu0 (!%p252_p9), %903, %v318_v3   ;;  %904 = vset.pattern.permute.xlu1 (!%p252_p9), %v975_v2  ;;  %vm977_vm2 = vmmov (!%p252_p9), 0   ;;  %v978_v32 = vmov (!%p252_p9), 0.0   ;;  %v463_v33 = vld [vmem:[%s1208_s4] sm:$0x1f] (!%p252_p9)  ;;  %vm473_vm3 = vcmask (!%p252_p9), 1041408   ;;  %vm979_vm4 = vmmov (!%p252_p9), 1   ;;  %s1162_s24 = scalar_lea.hbm (!%p252_p9), %s1211_s7, %s1069_s14 }
  0x13   : > { %855 = vmatprep.subr.bf16.mxu1 (!%p252_p9), %v976_v31  ;;  %799 = vmatprep.mubr.msk.f32.mxu1 (!%p252_p9), %vm977_vm2, %v978_v32  ;;  %v549_v34 = vld [vmem:[#allocation2] sm:$0x1] (!%p252_p9)  ;;  %vm857_vm5 = vmpackc.low (!%p252_p9), %vm473_vm3, %vm979_vm4  ;;  %vm469_vm6 = vcmask (!%p252_p9), 80896   ;;  %vm563_vm7 = vcmask (!%p252_p9), 1044480   ;;  %vm559_vm8 = vcmask (!%p252_p9), 39936   ;;  %v556_v52 = vshrl.u32 (!%p252_p9), %v555_v51, 7 }
  0x14   : > { %466 = vperm.xlu1 (!%p252_p9), %904, %v463_v33   ;;  %v462_v44 = vld [vmem:[%s1207_s3] sm:$0x1f] (!%p252_p9)  ;;  %s980_s30 = smov (!%p252_p9), [#allocation3]  }
  0x15   : > { %v548_v49 = vld [vmem:[%s1209_s5] sm:$0x1] (!%p252_p9)  ;;  %v557_v53 = vsub.s32 (!%p252_p9), 0, %v556_v52  ;;  %s915_s9 = sshll.u32 (!%p252_p9), %s980_s30, 4  ;;  %s916_s9 = int_to_ptr.vmem [resolvable:$false] %s915_s9 }
  0x16   : > { %327 = vperm.xlu0 (!%p252_p9), %903, %v319_v4   ;;  %s917_s10 = scalar_lea.vmem (!%p252_p9), %s916_s9, 32 }
  0x18   : > { %s292_s19 = scalar_select %p291_p10, %s1069_s14, 24  ;;  %552 = vperm.xlu1 %904, %v549_v34  }
  0x1a   : > { %s711_s22 = sshll.u32 %s292_s19, 3  ;;  %s284_s19 = sand.u32 1, %s965_s27  }
  0x1b   : > { %s1086_s25 = scalar_lea.vmem %s1204_s0, %s711_s22  ;;  %s285_s20 = scalar_lea.vmem [#allocation3], %s284_s19 }
  0x1c   : > { %v300_v6 = vld [vmem:[%s1086_s25] sm:$0xff]  ;;  %v301_v7 = vld [vmem:[%s1086_s25 + $0x8] sm:$0xff]  ;;  %v302_v8 = vld [vmem:[%s1086_s25 + $0x10] sm:$0xff]  ;;  %s651_s21 = sshll.u32 %s285_s20, 4  ;;  %s1164_s21 = int_to_ptr.vmem [resolvable:$true] %s651_s21 }
  0x1d   : > { %v807_v9 = vpack.c.bf16 %v301_v7, %v300_v6  ;;  %v303_v10 = vld [vmem:[%s1086_s25 + $0x18] sm:$0xff]  ;;  %v304_v12 = vld [vmem:[%s1086_s25 + $0x20] sm:$0xff]  ;;  %v305_v13 = vld [vmem:[%s1086_s25 + $0x28] sm:$0xff]  ;;  %s911_s6 = scalar_lea.vmem %s1164_s21, 16  ;;  %p918_p0 = scmp.lt.s32.totalorder %s1164_s21, %s916_s9 }
  0x1e   : > { %v813_v11 = vpack.c.bf16 %v303_v10, %v302_v8  ;;  %v819_v14 = vpack.c.bf16 %v305_v13, %v304_v12  ;;  %v306_v15 = vld [vmem:[%s1086_s25 + $0x30] sm:$0xff]  ;;  %v307_v16 = vld [vmem:[%s1086_s25 + $0x38] sm:$0xff]  ;;  %v308_v18 = vld [vmem:[%s1086_s25 + $0x40] sm:$0xff]  ;;  %p912_p11 = scmp.ne.s32.totalorder %s1164_s21, %s911_s6  ;;  %p919_p1 = scmp.lt.s32.totalorder %s917_s10, %s911_s6 }
  0x1f   : > { %809 = vmatprep.subr.msk.bf16.mxu0 %vm1090_vm1, %v807_v9  ;;  %v825_v17 = vpack.c.bf16 %v307_v16, %v306_v15  ;;  %v309_v19 = vld [vmem:[%s1086_s25 + $0x48] sm:$0xff]  ;;  %v310_v21 = vld [vmem:[%s1086_s25 + $0x50] sm:$0xff]  ;;  %v311_v22 = vld [vmem:[%s1086_s25 + $0x58] sm:$0xff] }
  0x20   : > { %812 = vmatpush3.bf16.xpose.msk.msra.mxu0 %vm1090_vm1, %v807_v9  ;;  %v831_v20 = vpack.c.bf16 %v309_v19, %v308_v18  ;;  %v837_v23 = vpack.c.bf16 %v311_v22, %v310_v21  ;;  %v312_v24 = vld [vmem:[%s1086_s25 + $0x60] sm:$0xff]  ;;  %v313_v25 = vld [vmem:[%s1086_s25 + $0x68] sm:$0xff]  ;;  %v314_v27 = vld [vmem:[%s1086_s25 + $0x70] sm:$0xff]  ;;  %p913_p12 = pnand %p912_p11, %p1059_p5  ;;  %p920_p2 = por %p919_p1, %p918_p0 }
  0x21   : > { %815 = vmatprep.subr.msk.bf16.mxu0 %vm1090_vm1, %v813_v11  ;;  %v843_v26 = vpack.c.bf16 %v313_v25, %v312_v24  ;;  %v315_v28 = vld [vmem:[%s1086_s25 + $0x78] sm:$0xff]  ;;  %s639_s25 = scalar_lea.sflag [#allocation4], %s284_s19 }
  0x22   : > { %v849_v29 = vpack.c.bf16 %v315_v28, %v314_v27  ;;  %p914_p13 = pneg %p913_p12 }
  0x24   : > { %p921_p3 = pnand %p920_p2, %p914_p13 }
  0x28   : > { %818 = vmatpush3.bf16.xpose.msk.msra.mxu0 %vm1090_vm1, %v813_v11 }
  0x29   : > { %821 = vmatprep.subr.msk.bf16.mxu0 %vm1090_vm1, %v819_v14 }
  0x30   : > { %824 = vmatpush3.bf16.xpose.msk.msra.mxu0 %vm1090_vm1, %v819_v14 }
  0x31   : > { %827 = vmatprep.subr.msk.bf16.mxu0 %vm1090_vm1, %v825_v17 }
  0x38   : > { %830 = vmatpush3.bf16.xpose.msk.msra.mxu0 %vm1090_vm1, %v825_v17 }
  0x39   : > { %833 = vmatprep.subr.msk.bf16.mxu0 %vm1090_vm1, %v831_v20 }
  0x40   : > { %836 = vmatpush3.bf16.xpose.msk.msra.mxu0 %vm1090_vm1, %v831_v20 }
  0x41   : > { %839 = vmatprep.subr.msk.bf16.mxu0 %vm1090_vm1, %v837_v23 }
  0x48   : > { %842 = vmatpush3.bf16.xpose.msk.msra.mxu0 %vm1090_vm1, %v837_v23 }
  0x49   : > { %845 = vmatprep.subr.msk.bf16.mxu0 %vm1090_vm1, %v843_v26 }
  0x50   : > { %848 = vmatpush3.bf16.xpose.msk.msra.mxu0 %vm1090_vm1, %v843_v26 }
  0x51   : > { %851 = vmatprep.subr.msk.bf16.mxu0 %vm1090_vm1, %v849_v29 }
  0x58   : > { %854 = vmatpush3.bf16.xpose.msk.msra.mxu0 %vm1090_vm1, %v849_v29 }
  0x5f   : > { %793 = vmatmul.mubr.msk.f32.vlgmr.msra.gmra.mrb[0].mxu0 %vm330_vm0, %v317_v30 }
  0x91   : > { %v323_v35 = vpop.permute.xlu0 %322 }
  0x93   : > { %v467_v45 = vpop.permute.xlu1 %466 }
  0x95   : > { %v328_v36 = vpop.permute.xlu0 %327 }
  0x97   : > { %v553_v54 = vpop.permute.xlu1 %552 }
  0x98   : > { %v558_v55 = vrot.slane %v553_v54, %v557_v53 }
 0x132   : > { %v794_v37 = vpop.f32.mrb[0].mxu0 }
 0x133   : > { %v457_v38 = vadd.f32 %v794_v37, %v328_v36  ;;  %v451_v39 = vpop.f32.mrb[1].mxu0 }
 0x134   : > { %v452_v40 = vadd.f32 %v451_v39, %v323_v35 }
 0x135   : > { %905 = vtanh.f32 %v457_v38 }
 0x136   : > { %907 = vtanh.f32 %v452_v40 }
 0x13f   : > { %v906_v41 = vpop.eup %905 }
 0x140   : > { %v908_v42 = vpop.eup %907 }
 0x141   : > { %v856_v43 = vpack.c.bf16 %v906_v41, %v908_v42 }
 0x143   : > { %858 = vmatpush3.bf16.msk.msra.mxu1 %vm857_vm5, %v856_v43 }
 0x144   : > { %802 = vmatprep.subr.mxu1 %v978_v32 }
 0x146   : > { %800 = vmatmul.mubr.msk.f32.vlgmr.msra.gmra.mrb[0].mxu1 %vm469_vm6, %v462_v44 }
 0x147   : > { %804 = vmatprep.mubr.msk.f32.mxu1 %vm977_vm2, %v978_v32 }
 0x219   : > { %v543_v46 = vpop.f32.mrb[0].mxu1 }
 0x21a   : > { %v544_v47 = vadd.f32 %v543_v46, %v467_v45  ;;  %v801_v48 = vpop.f32.mrb[1].mxu1 }
 0x21c   : > { %909 = vtanh.f32 %v544_v47 }
 0x226   : > { %v910_v50 = vpop.eup %909 }
 0x227   : > { %803 = vmatpush3.msk.msra.mxu1 %vm563_vm7, %v910_v50 }
 0x228   : > { %805 = vmatmul.mubr.msk.f32.vlgmr.msra.gmra.mrb[2].mxu1 %vm559_vm8, %v548_v49 }
 0x2fb   : > { %v633_v56 = vpop.f32.mrb[2].mxu1 }
 0x2fc   : > { %v634_v57 = vadd.f32 %v633_v56, %v558_v55  ;;  %v806_v58 = vpop.f32.mrb[3].mxu1 }
 0x2fe   : > { %637 = vst [vmem:[%s285_s20] sm:$0x1] %v634_v57 }
 0x2ff   : > { %924 = shalt.err (!%p921_p3)
}
 0x300   : > { %s925_s14 = scalar_lea.hbm %s1162_s24, 16  ;;  %s929_s17 = scalar_lea.hbm %s1211_s7, 32 }
 0x301   : > { %p926_p4 = scmp.ne.s32.totalorder %s1162_s24, %s925_s14  ;;  %p930_p9 = scmp.lt.u32.totalorder %s1162_s24, %s1211_s7 }
 0x302   : > { %p931_p10 = scmp.lt.u32.totalorder %s929_s17, %s925_s14  ;;  %p933_p12 = scmp.lt.u32.totalorder %s925_s14, %s1162_s24 }
 0x303   : > { %p927_p7 = pnand %p926_p4, %p1059_p5 }
 0x304   : > { %p932_p11 = por %p931_p10, %p930_p9 }
 0x305   : > { %p928_p8 = pneg %p927_p7 }
 0x306   : > { %p934_p13 = por %p933_p12, %p932_p11 }
 0x308   : > { %p935_p0 = pnand %p934_p13, %p928_p8 }
 0x30a   : > { %938 = shalt.err (!%p935_p0)
}
 0x30b   : > { %859 = dma.vmem_to_hbm [thread:$0]  (%p1059_p5), %s1164_s21, 16, %s1162_s24, %s639_s25  }
 0x30c PF: > { %p865_p1 = scmp.ge.s32.totalorder %s973_s29, 2  ;;  %s663_s20 = sand.u32 1, %s961_s26  }
 0x30d   : > { %s664_s22 = scalar_lea.sflag [#allocation4], %s663_s20 }
 0x30e   : > { %p862_p2 = pnand %p865_p1, %p1063_p6 }
 0x310   : > { %956 = dma.done.wait (!%p862_p2), %s664_s22, 16  }
 0x311   : > { %958 = vsyncadd (!%p862_p2), %s664_s22, 4294967280  ;;  %p19_p3 = scmp.ge.s32.totalorder %s1047_s8, 4   ;;  %s1216_s26 = smov %s965_s27 }
 0x312   : > { %s1217_s27 = smov %s969_s28  ;;  %s1218_s28 = smov %s1057_s11 }
 0x313   : > { %s1219_s29 = smov %s1047_s8  ;;  %21 = sbr.rel (!%p19_p3) target bundleno = 6 (0x6), region = 83 }
 0x31a   :  { %668 = vsyncpa [#allocation4], 1 }
 0x31b   :  { %670 = vsyncpa [#allocation4 + $0x1], 1 }

</bundles_post_ra>
